<compile_context>
chip_gen: v7x
topology: tpu7x:2x2x1
jax: 0.10.0
libtpu: 0.0.40
codegen_flags: <defaults>
</compile_context>

<pallas_src>
import jax
import jax.numpy as jnp
from jax.experimental import pallas as pl
from jax.experimental.pallas import tpu as pltpu


def _round_up(n, m):
    return (n + m - 1) // m * m


def gating_kernel(w_ref, b_ref, x_ref, o_ref):
    # w_ref: (D, E)  resident, pre-transposed nn.Linear weight (tiny)
    # b_ref: (1, E)  resident bias (f32)
    # x_ref: (TB, D) one contiguous batch tile of activations, native dtype
    # o_ref: (TB, E) gates for this tile, already in PyTorch (B, E) layout
    logits = jnp.dot(x_ref[...], w_ref[...],
                     preferred_element_type=jnp.float32) + b_ref[...]
    m = jnp.max(logits, axis=1, keepdims=True)      # lane reduce over E (XLU, tiny)
    e = jnp.exp(logits - m)                         # EUP
    denom = jnp.sum(e, axis=1, keepdims=True)       # >= 1 by construction
    # Exact normalization so gates sum to 1 to float rounding (no approx reciprocal).
    o_ref[...] = (e / denom).astype(o_ref.dtype)


def gating_network(x, w, b, *, target_tile_bytes=4 << 20):
    """softmax(x @ w.T + b, axis=1).  x: (B, D), w: (E, D), b: (E,) -> (B, E)."""
    B, D = x.shape
    E = w.shape[0]

    compute_dtype = x.dtype                   # keep x in its native dtype (no cast pass)
    out_dtype = x.dtype                       # gates in input dtype (halves bf16 writes)
    itemsize = jnp.dtype(compute_dtype).itemsize
    out_itemsize = jnp.dtype(out_dtype).itemsize

    # Tiny one-time parameter prep; nothing in the wrapper ever touches the big x tensor.
    w_t = jnp.transpose(w).astype(compute_dtype)      # (D, E): natural (M,K)@(K,N) matmul
    b_r = b.astype(jnp.float32).reshape(1, E)

    d_lanes = _round_up(D, 128)               # VMEM lane-pads the minor dim
    e_lanes = _round_up(E, 128)

    if B <= 128:
        TB = B                                # single block equal to the full batch dim
    else:
        # Size the x tile in bytes so the ~0.35us/step overhead is amortized; cap the
        # double-buffered x footprint at ~32 MiB so v7x's 64 MiB VMEM is never blown.
        tb = (target_tile_bytes // (d_lanes * itemsize)) // 128 * 128
        cap = ((32 << 20) // (2 * d_lanes * itemsize)) // 128 * 128
        tb = max(128, min(tb, max(128, cap)))
        if B >= 256:
            # Keep >= 2 grid steps so megacore sharding can use both v7x TensorCores.
            tb = min(tb, _round_up(pl.cdiv(B, 2), 128))
        TB = min(tb, _round_up(B, 128))
    # TODO(synk): for very large D (>= ~8K) add a trailing "arbitrary" reduction axis
    # over D with an f32 accumulator instead of shrinking TB.

    grid = (pl.cdiv(B, TB),)                  # ragged last block allowed; no jnp.pad of x

    # VMEM budget: 2x x tile + 2x (lane-padded) out tile + params, with headroom.
    need = (2 * TB * d_lanes * itemsize
            + 2 * TB * e_lanes * out_itemsize
            + d_lanes * e_lanes * itemsize
            + (1 << 20))
    vmem_limit = int(min(max(2 * need, 32 << 20), 48 << 20))

    return pl.pallas_call(
        gating_kernel,
        out_shape=jax.ShapeDtypeStruct((B, E), out_dtype),
        grid_spec=pltpu.PrefetchScalarGridSpec(
            num_scalar_prefetch=0,
            grid=grid,
            in_specs=[
                pl.BlockSpec((D, E), lambda i: (0, 0)),    # weights: VMEM-resident
                pl.BlockSpec((1, E), lambda i: (0, 0)),    # bias:    VMEM-resident
                pl.BlockSpec((TB, D), lambda i: (i, 0)),   # x: contiguous batch tiles
            ],
            out_specs=pl.BlockSpec((TB, E), lambda i: (i, 0)),  # PyTorch (B, E) layout
        ),
        compiler_params=pltpu.CompilerParams(
            dimension_semantics=("parallel",),             # megacore sharding on v7x
            vmem_limit_bytes=vmem_limit,
        ),
        cost_estimate=pl.CostEstimate(
            flops=2 * B * D * E,
            transcendentals=B * E,
            bytes_accessed=itemsize * (B * D + D * E) + 4 * E + out_itemsize * B * E,
        ),
    )(w_t, b_r, x)


if __name__ == "__main__":
    input_dim = 64
    num_experts = 4
    batch = 8

    key = jax.random.PRNGKey(0)
    kx, kw, kb, kx2 = jax.random.split(key, 4)

    # Deterministic "nn.Linear"-style parameters (uniform in +-1/sqrt(fan_in)),
    # stored in PyTorch layout: weight (num_experts, input_dim), bias (num_experts,).
    bound = 1.0 / (input_dim ** 0.5)
    w = jax.random.uniform(kw, (num_experts, input_dim),
                           minval=-bound, maxval=bound, dtype=jnp.float32)
    b = jax.random.uniform(kb, (num_experts,),
                           minval=-bound, maxval=bound, dtype=jnp.float32)
    x = jax.random.normal(kx, (batch, input_dim), dtype=jnp.float32)

    out = jax.block_until_ready(gating_network(x, w, b))
    ref = jax.nn.softmax(x @ w.T + b, axis=1)
    assert out.shape == (batch, num_experts)
    # Loose matmul tolerance (MXU vs XLA f32 accumulation order); softmax itself is exact.
    assert jnp.allclose(out, ref, atol=5e-3, rtol=5e-3)
    # Exact normalization: rows sum to 1 within float rounding.
    assert jnp.allclose(jnp.sum(out, axis=1), 1.0, atol=1e-3)

    # Exercise the multi-tile pipelined grid path (grid=3, ragged last block).
    x2 = jax.random.normal(kx2, (300, input_dim), dtype=jnp.float32)
    out2 = jax.block_until_ready(
        gating_network(x2, w, b, target_tile_bytes=128 * 128 * 4))
    ref2 = jax.nn.softmax(x2 @ w.T + b, axis=1)
    assert out2.shape == (300, num_experts)
    assert jnp.allclose(out2, ref2, atol=5e-3, rtol=5e-3)
    assert jnp.allclose(jnp.sum(out2, axis=1), 1.0, atol=1e-3)

    print("KERNEL_OK")
</pallas_src>

<mosaic_0001>
module attributes {stable_mosaic.version = 11 : i64} {
  func.func @gating_kernel(%arg0: i32, %arg1: memref<64x4xf32, #tpu.memory_space<vmem>>, %arg2: memref<1x4xf32, #tpu.memory_space<vmem>>, %arg3: memref<8x64xf32, #tpu.memory_space<vmem>>, %arg4: memref<8x4xf32, #tpu.memory_space<vmem>>) attributes {dimension_semantics = [#tpu.dimension_semantics<parallel>], iteration_bounds = array<i64: 1>, scalar_prefetch = 0 : i64, scratch_operands = 0 : i64, tpu.core_type = #tpu.core_type<tc>, window_params = [{pipeline_mode = #tpu.pipeline_mode<synchronous>, transform_indices = @transform_0, window_bounds = array<i64: 64, 4>}, {pipeline_mode = #tpu.pipeline_mode<synchronous>, transform_indices = @transform_1, window_bounds = array<i64: 1, 4>}, {transform_indices = @transform_2, window_bounds = array<i64: 8, 64>}, {transform_indices = @transform_3, window_bounds = array<i64: 8, 4>}]} {
    %c0 = arith.constant 0 : index
    %c0_0 = arith.constant 0 : index
    %0 = vector.load %arg3[%c0, %c0_0] : memref<8x64xf32, #tpu.memory_space<vmem>>, vector<8x64xf32>
    %c0_1 = arith.constant 0 : index
    %c0_2 = arith.constant 0 : index
    %1 = vector.load %arg1[%c0_1, %c0_2] : memref<64x4xf32, #tpu.memory_space<vmem>>, vector<64x4xf32>
    %cst = arith.constant dense<0.000000e+00> : vector<8x4xf32>
    %2 = tpu.matmul %0, %1, %cst {dimension_numbers = #tpu.dot_dimension_numbers<[1], [0], [0], [1], [0, 0, 1, 1], [], []>} : vector<8x64xf32>, vector<64x4xf32>, vector<8x4xf32> -> vector<8x4xf32>
    %c0_3 = arith.constant 0 : index
    %c0_4 = arith.constant 0 : index
    %3 = vector.load %arg2[%c0_3, %c0_4] : memref<1x4xf32, #tpu.memory_space<vmem>>, vector<1x4xf32>
    %4 = vector.broadcast %3 : vector<1x4xf32> to vector<8x4xf32>
    %5 = arith.addf %2, %4 : vector<8x4xf32>
    %cst_5 = arith.constant dense<0xFF800000> : vector<8xf32>
    %6 = vector.multi_reduction <maximumf>, %5, %cst_5 [1] : vector<8x4xf32> to vector<8xf32>
    %7 = vector.shape_cast %6 : vector<8xf32> to vector<8x1xf32>
    %8 = vector.broadcast %7 : vector<8x1xf32> to vector<8x4xf32>
    %9 = arith.subf %5, %8 : vector<8x4xf32>
    %10 = math.exp %9 : vector<8x4xf32>
    %cst_6 = arith.constant dense<0.000000e+00> : vector<8xf32>
    %11 = vector.multi_reduction <add>, %10, %cst_6 [1] : vector<8x4xf32> to vector<8xf32>
    %12 = vector.shape_cast %11 : vector<8xf32> to vector<8x1xf32>
    %13 = vector.broadcast %12 : vector<8x1xf32> to vector<8x4xf32>
    %14 = arith.divf %10, %13 : vector<8x4xf32>
    %c0_7 = arith.constant 0 : index
    %c0_8 = arith.constant 0 : index
    %15 = vector.load %arg4[%c0_7, %c0_8] : memref<8x4xf32, #tpu.memory_space<vmem>>, vector<8x4xf32>
    tpu.vector_store %arg4[%c0_7, %c0_8], %14 {strides = array<i32>} : memref<8x4xf32, #tpu.memory_space<vmem>>, vector<8x4xf32>,
    return
  }
  func.func @transform_0(%arg0: i32) -> (i32, i32) {
    %c0_i32 = arith.constant 0 : i32
    %c0_i32_0 = arith.constant 0 : i32
    %c0_i32_1 = arith.constant 0 : i32
    return %c0_i32, %c0_i32_0 : i32, i32
  }
  func.func @transform_1(%arg0: i32) -> (i32, i32) {
    %c0_i32 = arith.constant 0 : i32
    %c0_i32_0 = arith.constant 0 : i32
    %c0_i32_1 = arith.constant 0 : i32
    return %c0_i32, %c0_i32_0 : i32, i32
  }
  func.func @transform_2(%arg0: i32) -> (i32, i32) {
    %c0_i32 = arith.constant 0 : i32
    %c0_i32_0 = arith.constant 0 : i32
    return %arg0, %c0_i32 : i32, i32
  }
  func.func @transform_3(%arg0: i32) -> (i32, i32) {
    %c0_i32 = arith.constant 0 : i32
    %c0_i32_0 = arith.constant 0 : i32
    return %arg0, %c0_i32 : i32, i32
  }
}

</mosaic_0001>

<bundles_post_ra>
// kernel: tpu_custom_call.1
= control target key start
LH: loop header
LB: loop body
LE: loop exit
PB: predicated region body
PF: predicated region fallthrough
CT: control target
= control target key end

     0   :  { %v170_v0 = vmov 0.0|0.0   ;;  %vm171_vm0 = vmmov 0   ;;  %v172_v4 = vmov 0.0   ;;  %vm30_vm1 = vcmask 523264   ;;  %s229_s0 = inlined_call_operand.vmem [shape: f32[64,4], index: 0, kind: input, shape index: {}]   ;;  %s230_s2 = inlined_call_operand.vmem [shape: f32[8,64], index: 2, kind: input, shape index: {}]   ;;  %s231_s1 = inlined_call_operand.vmem [shape: f32[1,4], index: 1, kind: input, shape index: {}]   ;;  %s232_s3 = inlined_call_operand.vmem [shape: f32[8,4], index: 3, kind: output, shape index: {}]  }
   0x1   :  { %151 = vmatprep.subr.bf16.mxu0 %v170_v0  ;;  %v15_v1 = vld [vmem:[%s229_s0] sm:$0xff]  ;;  %v16_v2 = vld [vmem:[%s229_s0 + $0x8] sm:$0xff]  ;;  %v17_v3 = vld [vmem:[%s229_s0 + $0x10] sm:$0xff]  ;;  %148 = vmatprep.mubr.msk.f32.mxu0 %vm171_vm0, %v172_v4  ;;  %vm104_vm2 = vcmask 31744  }
   0x2   :  { %v152_v5 = vpack.c.bf16 %v16_v2, %v15_v1  ;;  %v18_v6 = vld [vmem:[%s229_s0 + $0x18] sm:$0xff]  ;;  %v19_v8 = vld [vmem:[%s229_s0 + $0x20] sm:$0xff]  ;;  %v20_v9 = vld [vmem:[%s229_s0 + $0x28] sm:$0xff] }
   0x3   :  { %v155_v7 = vpack.c.bf16 %v18_v6, %v17_v3  ;;  %v158_v10 = vpack.c.bf16 %v20_v9, %v19_v8  ;;  %v21_v11 = vld [vmem:[%s229_s0 + $0x30] sm:$0xff]  ;;  %v22_v12 = vld [vmem:[%s229_s0 + $0x38] sm:$0xff]  ;;  %v14_v14 = vld [vmem:[%s230_s2] sm:$0xff] }
   0x4   :  { %153 = vmatpush3.bf16.msra.mxu0 %v152_v5  ;;  %v161_v13 = vpack.c.bf16 %v22_v12, %v21_v11  ;;  %v121_v15 = vld [vmem:[%s231_s1] ss:$0 sm:$0xff] }
   0x5   :  { %154 = vmatprep.subr.bf16.mxu0 %v170_v0 }
   0x8   :  { %156 = vmatpush3.bf16.msra.mxu0 %v155_v7 }
   0x9   :  { %157 = vmatprep.subr.bf16.mxu0 %v170_v0 }
   0xc   :  { %159 = vmatpush3.bf16.msra.mxu0 %v158_v10 }
   0xd   :  { %160 = vmatprep.subr.bf16.mxu0 %v170_v0 }
  0x10   :  { %162 = vmatpush3.bf16.msra.mxu0 %v161_v13 }
  0x13   :  { %149 = vmatmul.mubr.msk.f32.vlgmr.msra.gmra.mrb[0].mxu0 %vm30_vm1, %v14_v14 }
  0xe6   :  { %v100_v16 = vpop.f32.mrb[0].mxu0 }
  0xe7   :  { %v101_v17 = vadd.f32 %v121_v15, %v100_v16  ;;  %v150_v18 = vpop.f32.mrb[1].mxu0 }
  0xe9   :  { %v105_v19 = vsel %vm104_vm2, %v101_v17, -inf }
  0xea   :  { %106 = vmax.xlane.f32.xlu0 %v105_v19 }
 0x177   :  { %v107_v20 = vpop.xlane.xlu0 %106 }
 0x178   :  { %v108_v21 = vsub.f32 %v101_v17, %v107_v20 }
 0x17a   :  { %v109_v22 = vmul.f32 1.442695, %v108_v21 }
 0x17c   :  { %166 = vpow2.f32 %v109_v22 }
 0x186   :  { %v167_v23 = vpop.eup %166 }
 0x187   :  { %v111_v24 = vsel %vm104_vm2, %v167_v23, 0.0 }
 0x188   :  { %112 = vadd.xlane.f32.xlu0 %v111_v24 }
 0x215   :  { %v113_v25 = vpop.xlane.xlu0 %112 }
 0x216   :  { %168 = vrcp.f32 %v113_v25 }
 0x220   :  { %v169_v26 = vpop.eup %168 }
 0x221   :  { %v115_v27 = vmul.f32 %v169_v26, %v167_v23 }
 0x223   :  { %116 = vst.msk [vmem:[%s232_s3] sm:$0xff] %vm104_vm2, %v115_v27 }

</bundles_post_ra>
